<compile_context>
chip_gen: v6e
topology: v6e:2x2x1
jax: 0.10.0
libtpu: 0.0.40
codegen_flags: <defaults>
</compile_context>

<pallas_src>
import jax
import jax.numpy as jnp
from jax import lax
from jax.experimental import pallas as pl
from jax.experimental.pallas import tpu as pltpu

# The torch forward indexes the num_scale raw splits with the softmax channel
# index, so it requires num_scale >= num_classes; we use the intended
# num_classes == num_scale configuration.
NUM_CLASSES = 4
NUM_SCALE = 4
HIDDEN = 512
H = W = 16
N = 2
CIN = NUM_CLASSES * NUM_SCALE   # 16
P = H * W                       # 256 pixels per image
NTAPS = 9                       # 3x3 conv taps


def asm_kernel(xcol_ref, wf_ref, bf_ref, out_ref):
    """xcol_ref: (9*CIN, N*P), wf_ref: (9, C, CIN), bf_ref: (C, 1), out: (1, N*P)."""
    np_ = xcol_ref.shape[1]

    # Fused conv1+conv2 as 9 small (C, CIN) @ (CIN, N*P) MXU pushes.
    # Tap 4 (the 3x3 centre) is exactly the raw input channels -> reuse it.
    acc = jnp.zeros((NUM_CLASSES, np_), jnp.float32)
    xraw = None
    for t in range(NTAPS):
        chunk = xcol_ref[pl.ds(t * CIN, CIN), :]                  # (CIN, N*P)
        acc = acc + jnp.dot(wf_ref[t], chunk,
                            preferred_element_type=jnp.float32)   # (C, N*P)
        if t == 4:
            xraw = chunk
    logits = acc + bf_ref[...]                                    # (C, N*P)

    # softmax over the class (sublane) axis; all ops on full-lane rows.
    m = jnp.max(logits, axis=0, keepdims=True)
    e = jnp.exp(logits - m)
    denom = jnp.sum(e, axis=0, keepdims=True)
    att = e * pl.reciprocal(denom, approx=True)                   # (C, N*P)

    # scale-weighted sum of the raw score maps
    # (torch loop: attention channel `ind` weights raw scale split `ind`)
    s_map = att[0:1, :] * xraw[0:NUM_CLASSES, :]
    for ind in range(1, NUM_SCALE):
        s_map = s_map + att[ind:ind + 1, :] * \
            xraw[ind * NUM_CLASSES:(ind + 1) * NUM_CLASSES, :]    # (C, N*P)

    # argmax over classes (first-max wins on ties, like torch.argmax),
    # computed on lane-dense (1, N*P) rows.
    best_val = s_map[0:1, :]
    best_idx = jnp.zeros((1, np_), jnp.int32)
    for c in range(1, NUM_CLASSES):
        v = s_map[c:c + 1, :]
        better = v > best_val
        best_val = jnp.where(better, v, best_val)
        best_idx = jnp.where(better, jnp.int32(c), best_idx)
    out_ref[...] = best_idx                                       # unmasked lane-dense store


def fold_asm_weights(w1, b1, w2, b2):
    """Fold conv1(3x3)+conv2(1x1) once at init (Dropout == identity in eval).

    Returns wf9 (9, C, CIN) and bf (C, 1).
    """
    hidden, cin = w1.shape[0], w1.shape[1]
    # torch Conv2d weights are OIHW; match the im2col feature order
    # feature = (ky*3 + kx)*CIN + c.
    w1col = jnp.transpose(w1, (2, 3, 1, 0)).reshape(9 * cin, hidden)   # (144, 512)
    w2mat = jnp.transpose(w2[:, :, 0, 0], (1, 0))                      # (512, C)
    wf = jnp.transpose(w1col @ w2mat, (1, 0))                          # (C, 144)
    wf9 = wf.reshape(NUM_CLASSES, 9, cin).transpose(1, 0, 2)           # (9, C, CIN)
    bf = (b1 @ w2mat + b2).reshape(NUM_CLASSES, 1)                     # (C, 1)
    return wf9, bf


@jax.jit
def asm_forward(x_nchw, wf9, bf):
    """x_nchw: (N, num_classes*num_scale, H, W) f32.  Returns (N, H, W) int32."""
    n, cin, h, w = x_nchw.shape
    p = h * w

    # im2col with features on sublanes and (batch, pixel) flattened onto lanes:
    # feature = (ky*3 + kx)*CIN + c, lane = n*H*W + y*W + x.
    xpad = jnp.pad(x_nchw, ((0, 0), (0, 0), (1, 1), (1, 1)))
    cols = [xpad[:, :, dy:dy + h, dx:dx + w] for dy in range(3) for dx in range(3)]
    xcol = jnp.concatenate(cols, axis=1)                               # (N, 9*CIN, H, W)
    xcol = jnp.transpose(xcol, (1, 0, 2, 3)).reshape(9 * cin, n * p)   # (9*CIN, N*P)

    out = pl.pallas_call(
        asm_kernel,
        out_shape=jax.ShapeDtypeStruct((1, n * p), jnp.int32),
        grid_spec=pltpu.PrefetchScalarGridSpec(
            num_scalar_prefetch=0,
            grid=(1,),                                   # single whole-batch step
            in_specs=[
                pl.BlockSpec((9 * cin, n * p), lambda i: (0, 0)),
                pl.BlockSpec((NTAPS, NUM_CLASSES, cin), lambda i: (0, 0, 0)),
                pl.BlockSpec((NUM_CLASSES, 1), lambda i: (0, 0)),
            ],
            out_specs=pl.BlockSpec((1, n * p), lambda i: (0, 0)),
        ),
    )(xcol, wf9, bf)
    return out.reshape(n, h, w)


def asm_reference(x_nchw, w1, b1, w2, b2):
    """Pure-JAX reference of the torch forward (eval mode). Returns (argmax, s_map)."""
    y = lax.conv_general_dilated(x_nchw, w1, (1, 1), ((1, 1), (1, 1)),
                                 dimension_numbers=("NCHW", "OIHW", "NCHW"))
    y = y + b1[None, :, None, None]
    y = lax.conv_general_dilated(y, w2, (1, 1), "VALID",
                                 dimension_numbers=("NCHW", "OIHW", "NCHW"))
    y = y + b2[None, :, None, None]
    att = jax.nn.softmax(y, axis=1)
    s_map = jnp.zeros_like(x_nchw[:, :NUM_CLASSES])
    for ind in range(NUM_SCALE):
        s_map = s_map + att[:, ind:ind + 1] * \
            x_nchw[:, ind * NUM_CLASSES:(ind + 1) * NUM_CLASSES]
    return jnp.argmax(s_map, axis=1).astype(jnp.int32), s_map


if __name__ == "__main__":
    key = jax.random.PRNGKey(0)
    k1, k2, k3, k4, k5 = jax.random.split(key, 5)
    # Deterministic synthetic parameters (shapes from nn.Conv2d in __init__).
    x = jax.random.normal(k1, (N, CIN, H, W), jnp.float32)
    w1 = jax.random.normal(k2, (HIDDEN, CIN, 3, 3), jnp.float32) * 0.05
    b1 = jax.random.normal(k3, (HIDDEN,), jnp.float32) * 0.05
    w2 = jax.random.normal(k4, (NUM_CLASSES, HIDDEN, 1, 1), jnp.float32) * 0.05
    b2 = jax.random.normal(k5, (NUM_CLASSES,), jnp.float32) * 0.05

    # Weight fold hoisted out of the forward path (runs once at init).
    wf9, bf = fold_asm_weights(w1, b1, w2, b2)
    wf9, bf = jax.block_until_ready((wf9, bf))

    out = asm_forward(x, wf9, bf)
    out = jax.block_until_ready(out)
    assert out.shape == (N, H, W), out.shape
    assert out.dtype == jnp.int32

    ref_idx, ref_smap = asm_reference(x, w1, b1, w2, b2)
    match = (out == ref_idx)
    if not bool(jnp.all(match)):
        # The conv fold and approx reciprocal reassociate fp math; tolerate a
        # class flip only where the reference's top-2 scores are essentially tied.
        sorted_s = jnp.sort(ref_smap, axis=1)
        gap = sorted_s[:, -1] - sorted_s[:, -2]
        assert bool(jnp.all(match | (gap < 1e-4))), "mismatch vs pure-JAX reference"
    print("KERNEL_OK")
</pallas_src>

<mosaic_0001>
module attributes {stable_mosaic.version = 11 : i64} {
  func.func @asm_kernel(%arg0: i32, %arg1: memref<144x512xf32, #tpu.memory_space<vmem>>, %arg2: memref<9x4x16xf32, #tpu.memory_space<vmem>>, %arg3: memref<4x1xf32, #tpu.memory_space<vmem>>, %arg4: memref<1x512xi32, #tpu.memory_space<vmem>>) attributes {dimension_semantics = [#tpu.dimension_semantics<arbitrary>], iteration_bounds = array<i64: 1>, scalar_prefetch = 0 : i64, scratch_operands = 0 : i64, tpu.core_type = #tpu.core_type<tc>, window_params = [{pipeline_mode = #tpu.pipeline_mode<synchronous>, transform_indices = @transform_0, window_bounds = array<i64: 144, 512>}, {pipeline_mode = #tpu.pipeline_mode<synchronous>, transform_indices = @transform_1, window_bounds = array<i64: 9, 4, 16>}, {pipeline_mode = #tpu.pipeline_mode<synchronous>, transform_indices = @transform_2, window_bounds = array<i64: 4, 1>}, {pipeline_mode = #tpu.pipeline_mode<synchronous>, transform_indices = @transform_3, window_bounds = array<i64: 1, 512>}]} {
    %cst = arith.constant 0.000000e+00 : f32
    %0 = vector.broadcast %cst : f32 to vector<4x512xf32>
    %c0 = arith.constant 0 : index
    %c0_0 = arith.constant 0 : index
    %1 = vector.load %arg1[%c0, %c0_0] : memref<144x512xf32, #tpu.memory_space<vmem>>, vector<16x512xf32>
    %c0_1 = arith.constant 0 : index
    %c0_2 = arith.constant 0 : index
    %c0_3 = arith.constant 0 : index
    %2 = vector.load %arg2[%c0_1, %c0_2, %c0_3] : memref<9x4x16xf32, #tpu.memory_space<vmem>>, vector<1x4x16xf32>
    %3 = vector.shape_cast %2 : vector<1x4x16xf32> to vector<4x16xf32>
    %cst_4 = arith.constant dense<0.000000e+00> : vector<4x512xf32>
    %4 = tpu.matmul %3, %1, %cst_4 {dimension_numbers = #tpu.dot_dimension_numbers<[1], [0], [0], [1], [0, 0, 1, 1], [], []>} : vector<4x16xf32>, vector<16x512xf32>, vector<4x512xf32> -> vector<4x512xf32>
    %5 = arith.addf %0, %4 : vector<4x512xf32>
    %c16 = arith.constant 16 : index
    %c0_5 = arith.constant 0 : index
    %6 = vector.load %arg1[%c16, %c0_5] : memref<144x512xf32, #tpu.memory_space<vmem>>, vector<16x512xf32>
    %c1 = arith.constant 1 : index
    %c0_6 = arith.constant 0 : index
    %c0_7 = arith.constant 0 : index
    %7 = vector.load %arg2[%c1, %c0_6, %c0_7] : memref<9x4x16xf32, #tpu.memory_space<vmem>>, vector<1x4x16xf32>
    %8 = vector.shape_cast %7 : vector<1x4x16xf32> to vector<4x16xf32>
    %cst_8 = arith.constant dense<0.000000e+00> : vector<4x512xf32>
    %9 = tpu.matmul %8, %6, %cst_8 {dimension_numbers = #tpu.dot_dimension_numbers<[1], [0], [0], [1], [0, 0, 1, 1], [], []>} : vector<4x16xf32>, vector<16x512xf32>, vector<4x512xf32> -> vector<4x512xf32>
    %10 = arith.addf %5, %9 : vector<4x512xf32>
    %c32 = arith.constant 32 : index
    %c0_9 = arith.constant 0 : index
    %11 = vector.load %arg1[%c32, %c0_9] : memref<144x512xf32, #tpu.memory_space<vmem>>, vector<16x512xf32>
    %c2 = arith.constant 2 : index
    %c0_10 = arith.constant 0 : index
    %c0_11 = arith.constant 0 : index
    %12 = vector.load %arg2[%c2, %c0_10, %c0_11] : memref<9x4x16xf32, #tpu.memory_space<vmem>>, vector<1x4x16xf32>
    %13 = vector.shape_cast %12 : vector<1x4x16xf32> to vector<4x16xf32>
    %cst_12 = arith.constant dense<0.000000e+00> : vector<4x512xf32>
    %14 = tpu.matmul %13, %11, %cst_12 {dimension_numbers = #tpu.dot_dimension_numbers<[1], [0], [0], [1], [0, 0, 1, 1], [], []>} : vector<4x16xf32>, vector<16x512xf32>, vector<4x512xf32> -> vector<4x512xf32>
    %15 = arith.addf %10, %14 : vector<4x512xf32>
    %c48 = arith.constant 48 : index
    %c0_13 = arith.constant 0 : index
    %16 = vector.load %arg1[%c48, %c0_13] : memref<144x512xf32, #tpu.memory_space<vmem>>, vector<16x512xf32>
    %c3 = arith.constant 3 : index
    %c0_14 = arith.constant 0 : index
    %c0_15 = arith.constant 0 : index
    %17 = vector.load %arg2[%c3, %c0_14, %c0_15] : memref<9x4x16xf32, #tpu.memory_space<vmem>>, vector<1x4x16xf32>
    %18 = vector.shape_cast %17 : vector<1x4x16xf32> to vector<4x16xf32>
    %cst_16 = arith.constant dense<0.000000e+00> : vector<4x512xf32>
    %19 = tpu.matmul %18, %16, %cst_16 {dimension_numbers = #tpu.dot_dimension_numbers<[1], [0], [0], [1], [0, 0, 1, 1], [], []>} : vector<4x16xf32>, vector<16x512xf32>, vector<4x512xf32> -> vector<4x512xf32>
    %20 = arith.addf %15, %19 : vector<4x512xf32>
    %c64 = arith.constant 64 : index
    %c0_17 = arith.constant 0 : index
    %21 = vector.load %arg1[%c64, %c0_17] : memref<144x512xf32, #tpu.memory_space<vmem>>, vector<16x512xf32>
    %c4 = arith.constant 4 : index
    %c0_18 = arith.constant 0 : index
    %c0_19 = arith.constant 0 : index
    %22 = vector.load %arg2[%c4, %c0_18, %c0_19] : memref<9x4x16xf32, #tpu.memory_space<vmem>>, vector<1x4x16xf32>
    %23 = vector.shape_cast %22 : vector<1x4x16xf32> to vector<4x16xf32>
    %cst_20 = arith.constant dense<0.000000e+00> : vector<4x512xf32>
    %24 = tpu.matmul %23, %21, %cst_20 {dimension_numbers = #tpu.dot_dimension_numbers<[1], [0], [0], [1], [0, 0, 1, 1], [], []>} : vector<4x16xf32>, vector<16x512xf32>, vector<4x512xf32> -> vector<4x512xf32>
    %25 = arith.addf %20, %24 : vector<4x512xf32>
    %c80 = arith.constant 80 : index
    %c0_21 = arith.constant 0 : index
    %26 = vector.load %arg1[%c80, %c0_21] : memref<144x512xf32, #tpu.memory_space<vmem>>, vector<16x512xf32>
    %c5 = arith.constant 5 : index
    %c0_22 = arith.constant 0 : index
    %c0_23 = arith.constant 0 : index
    %27 = vector.load %arg2[%c5, %c0_22, %c0_23] : memref<9x4x16xf32, #tpu.memory_space<vmem>>, vector<1x4x16xf32>
    %28 = vector.shape_cast %27 : vector<1x4x16xf32> to vector<4x16xf32>
    %cst_24 = arith.constant dense<0.000000e+00> : vector<4x512xf32>
    %29 = tpu.matmul %28, %26, %cst_24 {dimension_numbers = #tpu.dot_dimension_numbers<[1], [0], [0], [1], [0, 0, 1, 1], [], []>} : vector<4x16xf32>, vector<16x512xf32>, vector<4x512xf32> -> vector<4x512xf32>
    %30 = arith.addf %25, %29 : vector<4x512xf32>
    %c96 = arith.constant 96 : index
    %c0_25 = arith.constant 0 : index
    %31 = vector.load %arg1[%c96, %c0_25] : memref<144x512xf32, #tpu.memory_space<vmem>>, vector<16x512xf32>
    %c6 = arith.constant 6 : index
    %c0_26 = arith.constant 0 : index
    %c0_27 = arith.constant 0 : index
    %32 = vector.load %arg2[%c6, %c0_26, %c0_27] : memref<9x4x16xf32, #tpu.memory_space<vmem>>, vector<1x4x16xf32>
    %33 = vector.shape_cast %32 : vector<1x4x16xf32> to vector<4x16xf32>
    %cst_28 = arith.constant dense<0.000000e+00> : vector<4x512xf32>
    %34 = tpu.matmul %33, %31, %cst_28 {dimension_numbers = #tpu.dot_dimension_numbers<[1], [0], [0], [1], [0, 0, 1, 1], [], []>} : vector<4x16xf32>, vector<16x512xf32>, vector<4x512xf32> -> vector<4x512xf32>
    %35 = arith.addf %30, %34 : vector<4x512xf32>
    %c112 = arith.constant 112 : index
    %c0_29 = arith.constant 0 : index
    %36 = vector.load %arg1[%c112, %c0_29] : memref<144x512xf32, #tpu.memory_space<vmem>>, vector<16x512xf32>
    %c7 = arith.constant 7 : index
    %c0_30 = arith.constant 0 : index
    %c0_31 = arith.constant 0 : index
    %37 = vector.load %arg2[%c7, %c0_30, %c0_31] : memref<9x4x16xf32, #tpu.memory_space<vmem>>, vector<1x4x16xf32>
    %38 = vector.shape_cast %37 : vector<1x4x16xf32> to vector<4x16xf32>
    %cst_32 = arith.constant dense<0.000000e+00> : vector<4x512xf32>
    %39 = tpu.matmul %38, %36, %cst_32 {dimension_numbers = #tpu.dot_dimension_numbers<[1], [0], [0], [1], [0, 0, 1, 1], [], []>} : vector<4x16xf32>, vector<16x512xf32>, vector<4x512xf32> -> vector<4x512xf32>
    %40 = arith.addf %35, %39 : vector<4x512xf32>
    %c128 = arith.constant 128 : index
    %c0_33 = arith.constant 0 : index
    %41 = vector.load %arg1[%c128, %c0_33] : memref<144x512xf32, #tpu.memory_space<vmem>>, vector<16x512xf32>
    %c8 = arith.constant 8 : index
    %c0_34 = arith.constant 0 : index
    %c0_35 = arith.constant 0 : index
    %42 = vector.load %arg2[%c8, %c0_34, %c0_35] : memref<9x4x16xf32, #tpu.memory_space<vmem>>, vector<1x4x16xf32>
    %43 = vector.shape_cast %42 : vector<1x4x16xf32> to vector<4x16xf32>
    %cst_36 = arith.constant dense<0.000000e+00> : vector<4x512xf32>
    %44 = tpu.matmul %43, %41, %cst_36 {dimension_numbers = #tpu.dot_dimension_numbers<[1], [0], [0], [1], [0, 0, 1, 1], [], []>} : vector<4x16xf32>, vector<16x512xf32>, vector<4x512xf32> -> vector<4x512xf32>
    %45 = arith.addf %40, %44 : vector<4x512xf32>
    %c0_37 = arith.constant 0 : index
    %c0_38 = arith.constant 0 : index
    %46 = vector.load %arg3[%c0_37, %c0_38] : memref<4x1xf32, #tpu.memory_space<vmem>>, vector<4x1xf32>
    %47 = vector.broadcast %46 : vector<4x1xf32> to vector<4x512xf32>
    %48 = arith.addf %45, %47 : vector<4x512xf32>
    %cst_39 = arith.constant dense<0xFF800000> : vector<512xf32>
    %49 = vector.multi_reduction <maximumf>, %48, %cst_39 [0] : vector<4x512xf32> to vector<512xf32>
    %50 = vector.shape_cast %49 : vector<512xf32> to vector<1x512xf32>
    %51 = vector.broadcast %50 : vector<1x512xf32> to vector<4x512xf32>
    %52 = arith.subf %48, %51 : vector<4x512xf32>
    %53 = math.exp %52 : vector<4x512xf32>
    %cst_40 = arith.constant dense<0.000000e+00> : vector<512xf32>
    %54 = vector.multi_reduction <add>, %53, %cst_40 [0] : vector<4x512xf32> to vector<512xf32>
    %55 = vector.shape_cast %54 : vector<512xf32> to vector<1x512xf32>
    %56 = tpu.reciprocal %55 {approx = true} : vector<1x512xf32> -> vector<1x512xf32>
    %57 = vector.broadcast %56 : vector<1x512xf32> to vector<4x512xf32>
    %58 = arith.mulf %53, %57 : vector<4x512xf32>
    %59 = vector.extract_strided_slice %58 {offsets = [0, 0], sizes = [1, 512], strides = [1, 1]} : vector<4x512xf32> to vector<1x512xf32>
    %60 = vector.extract_strided_slice %21 {offsets = [0, 0], sizes = [4, 512], strides = [1, 1]} : vector<16x512xf32> to vector<4x512xf32>
    %61 = vector.broadcast %59 : vector<1x512xf32> to vector<4x512xf32>
    %62 = arith.mulf %61, %60 : vector<4x512xf32>
    %63 = vector.extract_strided_slice %58 {offsets = [1, 0], sizes = [1, 512], strides = [1, 1]} : vector<4x512xf32> to vector<1x512xf32>
    %64 = vector.extract_strided_slice %21 {offsets = [4, 0], sizes = [4, 512], strides = [1, 1]} : vector<16x512xf32> to vector<4x512xf32>
    %65 = vector.broadcast %63 : vector<1x512xf32> to vector<4x512xf32>
    %66 = arith.mulf %65, %64 : vector<4x512xf32>
    %67 = arith.addf %62, %66 : vector<4x512xf32>
    %68 = vector.extract_strided_slice %58 {offsets = [2, 0], sizes = [1, 512], strides = [1, 1]} : vector<4x512xf32> to vector<1x512xf32>
    %69 = vector.extract_strided_slice %21 {offsets = [8, 0], sizes = [4, 512], strides = [1, 1]} : vector<16x512xf32> to vector<4x512xf32>
    %70 = vector.broadcast %68 : vector<1x512xf32> to vector<4x512xf32>
    %71 = arith.mulf %70, %69 : vector<4x512xf32>
    %72 = arith.addf %67, %71 : vector<4x512xf32>
    %73 = vector.extract_strided_slice %58 {offsets = [3, 0], sizes = [1, 512], strides = [1, 1]} : vector<4x512xf32> to vector<1x512xf32>
    %74 = vector.extract_strided_slice %21 {offsets = [12, 0], sizes = [4, 512], strides = [1, 1]} : vector<16x512xf32> to vector<4x512xf32>
    %75 = vector.broadcast %73 : vector<1x512xf32> to vector<4x512xf32>
    %76 = arith.mulf %75, %74 : vector<4x512xf32>
    %77 = arith.addf %72, %76 : vector<4x512xf32>
    %78 = vector.extract_strided_slice %77 {offsets = [0, 0], sizes = [1, 512], strides = [1, 1]} : vector<4x512xf32> to vector<1x512xf32>
    %c0_i32 = arith.constant 0 : i32
    %79 = vector.broadcast %c0_i32 : i32 to vector<1x512xi32>
    %80 = vector.extract_strided_slice %77 {offsets = [1, 0], sizes = [1, 512], strides = [1, 1]} : vector<4x512xf32> to vector<1x512xf32>
    %81 = arith.cmpf ogt, %80, %78 : vector<1x512xf32>
    %82 = arith.select %81, %80, %78 : vector<1x512xi1>, vector<1x512xf32>
    %c1_i32 = arith.constant 1 : i32
    %83 = vector.broadcast %c1_i32 : i32 to vector<1x512xi32>
    %84 = arith.select %81, %83, %79 : vector<1x512xi1>, vector<1x512xi32>
    %85 = vector.extract_strided_slice %77 {offsets = [2, 0], sizes = [1, 512], strides = [1, 1]} : vector<4x512xf32> to vector<1x512xf32>
    %86 = arith.cmpf ogt, %85, %82 : vector<1x512xf32>
    %87 = arith.select %86, %85, %82 : vector<1x512xi1>, vector<1x512xf32>
    %c2_i32 = arith.constant 2 : i32
    %88 = vector.broadcast %c2_i32 : i32 to vector<1x512xi32>
    %89 = arith.select %86, %88, %84 : vector<1x512xi1>, vector<1x512xi32>
    %90 = vector.extract_strided_slice %77 {offsets = [3, 0], sizes = [1, 512], strides = [1, 1]} : vector<4x512xf32> to vector<1x512xf32>
    %91 = arith.cmpf ogt, %90, %87 : vector<1x512xf32>
    %c3_i32 = arith.constant 3 : i32
    %92 = vector.broadcast %c3_i32 : i32 to vector<1x512xi32>
    %93 = arith.select %91, %92, %89 : vector<1x512xi1>, vector<1x512xi32>
    %c0_41 = arith.constant 0 : index
    %c0_42 = arith.constant 0 : index
    %94 = vector.load %arg4[%c0_41, %c0_42] : memref<1x512xi32, #tpu.memory_space<vmem>>, vector<1x512xi32>
    tpu.vector_store %arg4[%c0_41, %c0_42], %93 {strides = array<i32>} : memref<1x512xi32, #tpu.memory_space<vmem>>, vector<1x512xi32>,
    return
  }
  func.func @transform_0(%arg0: i32) -> (i32, i32) {
    %c0_i32 = arith.constant 0 : i32
    %c0_i32_0 = arith.constant 0 : i32
    %c0_i32_1 = arith.constant 0 : i32
    return %c0_i32, %c0_i32_0 : i32, i32
  }
  func.func @transform_1(%arg0: i32) -> (i32, i32, i32) {
    %c0_i32 = arith.constant 0 : i32
    %c0_i32_0 = arith.constant 0 : i32
    %c0_i32_1 = arith.constant 0 : i32
    %c0_i32_2 = arith.constant 0 : i32
    return %c0_i32, %c0_i32_0, %c0_i32_1 : i32, i32, i32
  }
  func.func @transform_2(%arg0: i32) -> (i32, i32) {
    %c0_i32 = arith.constant 0 : i32
    %c0_i32_0 = arith.constant 0 : i32
    %c0_i32_1 = arith.constant 0 : i32
    return %c0_i32, %c0_i32_0 : i32, i32
  }
  func.func @transform_3(%arg0: i32) -> (i32, i32) {
    %c0_i32 = arith.constant 0 : i32
    %c0_i32_0 = arith.constant 0 : i32
    %c0_i32_1 = arith.constant 0 : i32
    return %c0_i32, %c0_i32_0 : i32, i32
  }
}

</mosaic_0001>

<bundles_post_ra>
// kernel: asm_forward.1
= control target key start
LH: loop header
LB: loop body
LE: loop exit
PB: predicated region body
PF: predicated region fallthrough
CT: control target
= control target key end

     0   :  { %v1796_v3 = vmov 0.0   ;;  %vm33_vm0 = vcmask 130048   ;;  %vm1447_vm1 = vcmask 1043456   ;;  %s2166_s0 = inlined_call_operand.vmem [shape: f32[144,512], index: 0, kind: input, shape index: {}]   ;;  %s2167_s1 = inlined_call_operand.vmem [shape: f32[9,4,16], index: 1, kind: input, shape index: {}]   ;;  %s2168_s2 = inlined_call_operand.vmem [shape: f32[4,1], index: 2, kind: input, shape index: {}]   ;;  %s2169_s3 = inlined_call_operand.vmem [shape: s32[1,512], index: 3, kind: output, shape index: {}]  }
   0x1   :  { %v28_v0 = vld [vmem:[%s2166_s0 + $0x68] sm:$0xff]  ;;  %v30_v1 = vld [vmem:[%s2166_s0 + $0x78] sm:$0xff]  ;;  %v27_v2 = vld [vmem:[%s2166_s0 + $0x60] sm:$0xff]  ;;  %101 = vmatprep.mubr.f32.mxu0 %v1796_v3  ;;  %172 = vmatprep.mubr.f32.mxu1 %v1796_v3 }
   0x2   :  { %65 = vmatprep.subr.mxu0 %v28_v0  ;;  %136 = vmatprep.subr.mxu1 %v30_v1  ;;  %v29_v4 = vld [vmem:[%s2166_s0 + $0x70] sm:$0xff]  ;;  %v24_v5 = vld [vmem:[%s2166_s0 + $0x48] sm:$0xff]  ;;  %v26_v6 = vld [vmem:[%s2166_s0 + $0x58] sm:$0xff] }
   0x3   :  { %66 = vmatpush1.msra.mxu0 %v27_v2  ;;  %137 = vmatpush1.msra.mxu1 %v29_v4  ;;  %v23_v7 = vld [vmem:[%s2166_s0 + $0x40] sm:$0xff]  ;;  %v25_v8 = vld [vmem:[%s2166_s0 + $0x50] sm:$0xff]  ;;  %v19_v10 = vld [vmem:[%s2166_s0 + $0x28] sm:$0xff] }
   0x4   :  { %v1750_v9 = vld [vmem:[%s2167_s1 + $0x4] sm:$0xf]  ;;  %67 = vmatprep.subr.mxu0 %v24_v5  ;;  %138 = vmatprep.subr.mxu1 %v26_v6  ;;  %v21_v11 = vld [vmem:[%s2166_s0 + $0x38] sm:$0xff]  ;;  %v20_v13 = vld [vmem:[%s2166_s0 + $0x30] sm:$0xff] }
   0x5   :  { %68 = vmatpush1.msra.mxu0 %v23_v7  ;;  %139 = vmatpush1.msra.mxu1 %v25_v8  ;;  %v18_v12 = vld [vmem:[%s2166_s0 + $0x20] sm:$0xff]  ;;  %v15_v14 = vld [vmem:[%s2166_s0 + $0x8] sm:$0xff]  ;;  %v17_v15 = vld [vmem:[%s2166_s0 + $0x18] sm:$0xff] }
   0x6   :  { %1751 = vmatmul.mubr.msk.f32.vlgmr.msra.gmra.mxu0 %vm33_vm0, %v1750_v9  ;;  %1752 = vmatmul.mubr.msk.f32.vlgmr.msra.gmra.mxu1 %vm33_vm0, %v1750_v9  ;;  %v14_v16 = vld [vmem:[%s2166_s0] sm:$0xff]  ;;  %v16_v17 = vld [vmem:[%s2166_s0 + $0x10] sm:$0xff]  ;;  %v329_v19 = vld [vmem:[%s2166_s0 + $0xa8] sm:$0xff] }
   0x7   :  { %210 = vmatprep.subr.mxu0 %v19_v10  ;;  %281 = vmatprep.subr.mxu1 %v21_v11  ;;  %v22_v18 = vld [vmem:[%s2167_s1] sm:$0xf]  ;;  %v331_v20 = vld [vmem:[%s2166_s0 + $0xb8] sm:$0xff]  ;;  %v330_v22 = vld [vmem:[%s2166_s0 + $0xb0] sm:$0xff] }
   0x8   :  { %211 = vmatpush1.msra.mxu0 %v18_v12  ;;  %282 = vmatpush1.msra.mxu1 %v20_v13  ;;  %v328_v21 = vld [vmem:[%s2166_s0 + $0xa0] sm:$0xff]  ;;  %v325_v23 = vld [vmem:[%s2166_s0 + $0x88] sm:$0xff]  ;;  %v327_v24 = vld [vmem:[%s2166_s0 + $0x98] sm:$0xff] }
   0x9   :  { %212 = vmatprep.subr.mxu0 %v15_v14  ;;  %283 = vmatprep.subr.mxu1 %v17_v15  ;;  %v324_v25 = vld [vmem:[%s2166_s0 + $0x80] sm:$0xff]  ;;  %v326_v26 = vld [vmem:[%s2166_s0 + $0x90] sm:$0xff]  ;;  %v1755_v27 = vld [vmem:[%s2167_s1 + $0x8] sm:$0xf] }
   0xa   :  { %213 = vmatpush1.msra.mxu0 %v14_v16  ;;  %246 = vmatprep.mubr.f32.mxu0 %v1796_v3  ;;  %v488_v28 = vld [vmem:[%s2166_s0 + $0xe8] sm:$0xff]  ;;  %v490_v29 = vld [vmem:[%s2166_s0 + $0xf8] sm:$0xff]  ;;  %v487_v30 = vld [vmem:[%s2166_s0 + $0xe0] sm:$0xff] }
   0xb   :  { %284 = vmatpush1.msra.mxu1 %v16_v17  ;;  %317 = vmatprep.mubr.f32.mxu1 %v1796_v3  ;;  %v489_v31 = vld [vmem:[%s2166_s0 + $0xf0] sm:$0xff]  ;;  %v484_v32 = vld [vmem:[%s2166_s0 + $0xc8] sm:$0xff]  ;;  %v486_v33 = vld [vmem:[%s2166_s0 + $0xd8] sm:$0xff] }
   0xc   :  { %1753 = vmatmul.mubr.msk.f32.vlgmr.msra.gmra.mxu0 %vm33_vm0, %v22_v18  ;;  %1754 = vmatmul.mubr.msk.f32.vlgmr.msra.gmra.mxu1 %vm33_vm0, %v22_v18  ;;  %v483_v34 = vld [vmem:[%s2166_s0 + $0xc0] sm:$0xff]  ;;  %v485_v35 = vld [vmem:[%s2166_s0 + $0xd0] sm:$0xff]  ;;  %v1758_v36 = vld [vmem:[%s2167_s1 + $0xc] sm:$0xf] }
   0xd   :  { %365 = vmatprep.subr.mxu0 %v329_v19  ;;  %436 = vmatprep.subr.mxu1 %v331_v20  ;;  %v1943_v37 = vld [vmem:[%s2166_s0 + $0x128] sm:$0xff]  ;;  %v1948_v38 = vld [vmem:[%s2166_s0 + $0x138] sm:$0xff]  ;;  %v1954_v39 = vld [vmem:[%s2166_s0 + $0x120] sm:$0xff]  ;;  %v1797_v20 = vmov 0  }
   0xe   :  { %366 = vmatpush1.msra.mxu0 %v328_v21  ;;  %437 = vmatpush1.msra.mxu1 %v330_v22  ;;  %v1959_v40 = vld [vmem:[%s2166_s0 + $0x130] sm:$0xff]  ;;  %v1966_v41 = vld [vmem:[%s2166_s0 + $0x108] sm:$0xff]  ;;  %v1971_v42 = vld [vmem:[%s2166_s0 + $0x118] sm:$0xff] }
   0xf   :  { %367 = vmatprep.subr.mxu0 %v325_v23  ;;  %438 = vmatprep.subr.mxu1 %v327_v24  ;;  %v1978_v43 = vld [vmem:[%s2166_s0 + $0x100] sm:$0xff]  ;;  %v1985_v44 = vld [vmem:[%s2166_s0 + $0x110] sm:$0xff]  ;;  %v806_v46 = vld [vmem:[%s2166_s0 + $0x168] sm:$0xff] }
  0x10   :  { %368 = vmatpush1.msra.mxu0 %v324_v25  ;;  %401 = vmatprep.mubr.f32.mxu0 %v1796_v3  ;;  %v1761_v45 = vld [vmem:[%s2167_s1 + $0x10] sm:$0xf]  ;;  %v808_v47 = vld [vmem:[%s2166_s0 + $0x178] sm:$0xff]  ;;  %v805_v48 = vld [vmem:[%s2166_s0 + $0x160] sm:$0xff] }
  0x11   :  { %439 = vmatpush1.msra.mxu1 %v326_v26  ;;  %472 = vmatprep.mubr.f32.mxu1 %v1796_v3  ;;  %v807_v49 = vld [vmem:[%s2166_s0 + $0x170] sm:$0xff]  ;;  %v802_v50 = vld [vmem:[%s2166_s0 + $0x148] sm:$0xff]  ;;  %v804_v51 = vld [vmem:[%s2166_s0 + $0x158] sm:$0xff] }
  0x12   :  { %1756 = vmatmul.mubr.msk.f32.vlgmr.msra.gmra.mxu0 %vm33_vm0, %v1755_v27  ;;  %1757 = vmatmul.mubr.msk.f32.vlgmr.msra.gmra.mxu1 %vm33_vm0, %v1755_v27  ;;  %v801_v52 = vld [vmem:[%s2166_s0 + $0x140] sm:$0xff]  ;;  %v803_v53 = vld [vmem:[%s2166_s0 + $0x150] sm:$0xff]  ;;  %v965_v55 = vld [vmem:[%s2166_s0 + $0x1a8] sm:$0xff] }
  0x13   :  { %524 = vmatprep.subr.mxu0 %v488_v28  ;;  %595 = vmatprep.subr.mxu1 %v490_v29  ;;  %v1764_v54 = vld [vmem:[%s2167_s1 + $0x14] sm:$0xf]  ;;  %v967_v56 = vld [vmem:[%s2166_s0 + $0x1b8] sm:$0xff]  ;;  %v964_v57 = vld [vmem:[%s2166_s0 + $0x1a0] sm:$0xff] }
  0x14   :  { %525 = vmatpush1.msra.mxu0 %v487_v30  ;;  %596 = vmatpush1.msra.mxu1 %v489_v31  ;;  %v966_v58 = vld [vmem:[%s2166_s0 + $0x1b0] sm:$0xff]  ;;  %v961_v59 = vld [vmem:[%s2166_s0 + $0x188] sm:$0xff]  ;;  %v963_v60 = vld [vmem:[%s2166_s0 + $0x198] sm:$0xff] }
  0x15   :  { %526 = vmatprep.subr.mxu0 %v484_v32  ;;  %597 = vmatprep.subr.mxu1 %v486_v33  ;;  %v960_v61 = vld [vmem:[%s2166_s0 + $0x180] sm:$0xff]  ;;  %v962_v62 = vld [vmem:[%s2166_s0 + $0x190] sm:$0xff]  ;;  %v1767_v63 = vld [vmem:[%s2167_s1 + $0x18] sm:$0xf] }
  0x16   :  { %527 = vmatpush1.msra.mxu0 %v483_v34  ;;  %560 = vmatprep.mubr.f32.mxu0 %v1796_v3  ;;  %v1124_v0 = vld [vmem:[%s2166_s0 + $0x1e8] sm:$0xff]  ;;  %v1126_v1 = vld [vmem:[%s2166_s0 + $0x1f8] sm:$0xff]  ;;  %v1123_v2 = vld [vmem:[%s2166_s0 + $0x1e0] sm:$0xff] }
  0x17   :  { %598 = vmatpush1.msra.mxu1 %v485_v35  ;;  %631 = vmatprep.mubr.f32.mxu1 %v1796_v3  ;;  %v1125_v4 = vld [vmem:[%s2166_s0 + $0x1f0] sm:$0xff]  ;;  %v1120_v5 = vld [vmem:[%s2166_s0 + $0x1c8] sm:$0xff]  ;;  %v1122_v6 = vld [vmem:[%s2166_s0 + $0x1d8] sm:$0xff] }
  0x18   :  { %1759 = vmatmul.mubr.msk.f32.vlgmr.msra.gmra.mxu0 %vm33_vm0, %v1758_v36  ;;  %1760 = vmatmul.mubr.msk.f32.vlgmr.msra.gmra.mxu1 %vm33_vm0, %v1758_v36  ;;  %v1119_v7 = vld [vmem:[%s2166_s0 + $0x1c0] sm:$0xff]  ;;  %v1121_v8 = vld [vmem:[%s2166_s0 + $0x1d0] sm:$0xff]  ;;  %v1770_v9 = vld [vmem:[%s2167_s1 + $0x1c] sm:$0xf] }
  0x19   :  { %683 = vmatprep.subr.mxu0 %v1943_v37  ;;  %754 = vmatprep.subr.mxu1 %v1948_v38  ;;  %v1283_v10 = vld [vmem:[%s2166_s0 + $0x228] sm:$0xff]  ;;  %v1285_v11 = vld [vmem:[%s2166_s0 + $0x238] sm:$0xff]  ;;  %v1282_v12 = vld [vmem:[%s2166_s0 + $0x220] sm:$0xff] }
  0x1a   :  { %684 = vmatpush1.msra.mxu0 %v1954_v39  ;;  %755 = vmatpush1.msra.mxu1 %v1959_v40  ;;  %v1284_v13 = vld [vmem:[%s2166_s0 + $0x230] sm:$0xff]  ;;  %v1279_v14 = vld [vmem:[%s2166_s0 + $0x208] sm:$0xff]  ;;  %v1281_v15 = vld [vmem:[%s2166_s0 + $0x218] sm:$0xff] }
  0x1b   :  { %685 = vmatprep.subr.mxu0 %v1966_v41  ;;  %756 = vmatprep.subr.mxu1 %v1971_v42  ;;  %v1278_v16 = vld [vmem:[%s2166_s0 + $0x200] sm:$0xff]  ;;  %v1280_v17 = vld [vmem:[%s2166_s0 + $0x210] sm:$0xff] }
  0x1c   :  { %686 = vmatpush1.msra.mxu0 %v1978_v43  ;;  %719 = vmatprep.mubr.f32.mxu0 %v1796_v3  ;;  %v1773_v18 = vld [vmem:[%s2167_s1 + $0x20] sm:$0xf] }
  0x1d   :  { %757 = vmatpush1.msra.mxu1 %v1985_v44  ;;  %790 = vmatprep.mubr.f32.mxu1 %v1796_v3  ;;  %v1437_v19 = vld [vmem:[%s2168_s2] sm:$0xf] }
  0x1e   :  { %1762 = vmatmul.mubr.msk.f32.vlgmr.msra.gmra.mxu0 %vm33_vm0, %v1761_v45  ;;  %1763 = vmatmul.mubr.msk.f32.vlgmr.msra.gmra.mxu1 %vm33_vm0, %v1761_v45 }
  0x1f   :  { %842 = vmatprep.subr.mxu0 %v806_v46  ;;  %913 = vmatprep.subr.mxu1 %v808_v47 }
  0x20   :  { %843 = vmatpush1.msra.mxu0 %v805_v48  ;;  %914 = vmatpush1.msra.mxu1 %v807_v49 }
  0x21   :  { %844 = vmatprep.subr.mxu0 %v802_v50  ;;  %915 = vmatprep.subr.mxu1 %v804_v51 }
  0x22   :  { %845 = vmatpush1.msra.mxu0 %v801_v52  ;;  %878 = vmatprep.mubr.f32.mxu0 %v1796_v3 }
  0x23   :  { %916 = vmatpush1.msra.mxu1 %v803_v53  ;;  %949 = vmatprep.mubr.f32.mxu1 %v1796_v3 }
  0x24   :  { %1765 = vmatmul.mubr.msk.f32.vlgmr.msra.gmra.mxu0 %vm33_vm0, %v1764_v54  ;;  %1766 = vmatmul.mubr.msk.f32.vlgmr.msra.gmra.mxu1 %vm33_vm0, %v1764_v54 }
  0x25   :  { %1001 = vmatprep.subr.mxu0 %v965_v55  ;;  %1072 = vmatprep.subr.mxu1 %v967_v56 }
  0x26   :  { %1002 = vmatpush1.msra.mxu0 %v964_v57  ;;  %1073 = vmatpush1.msra.mxu1 %v966_v58 }
  0x27   :  { %1003 = vmatprep.subr.mxu0 %v961_v59  ;;  %1074 = vmatprep.subr.mxu1 %v963_v60 }
  0x28   :  { %1004 = vmatpush1.msra.mxu0 %v960_v61  ;;  %1037 = vmatprep.mubr.f32.mxu0 %v1796_v3 }
  0x29   :  { %1075 = vmatpush1.msra.mxu1 %v962_v62  ;;  %1108 = vmatprep.mubr.f32.mxu1 %v1796_v3 }
  0x2a   :  { %1768 = vmatmul.mubr.msk.f32.vlgmr.msra.gmra.mxu0 %vm33_vm0, %v1767_v63  ;;  %1769 = vmatmul.mubr.msk.f32.vlgmr.msra.gmra.mxu1 %vm33_vm0, %v1767_v63 }
  0x2b   :  { %1160 = vmatprep.subr.mxu0 %v1124_v0  ;;  %1231 = vmatprep.subr.mxu1 %v1126_v1 }
  0x2c   :  { %1161 = vmatpush1.msra.mxu0 %v1123_v2  ;;  %1232 = vmatpush1.msra.mxu1 %v1125_v4 }
  0x2d   :  { %1162 = vmatprep.subr.mxu0 %v1120_v5  ;;  %1233 = vmatprep.subr.mxu1 %v1122_v6 }
  0x2e   :  { %1163 = vmatpush1.msra.mxu0 %v1119_v7  ;;  %1196 = vmatprep.mubr.f32.mxu0 %v1796_v3 }
  0x2f   :  { %1234 = vmatpush1.msra.mxu1 %v1121_v8  ;;  %1267 = vmatprep.mubr.f32.mxu1 %v1796_v3 }
  0x30   :  { %1771 = vmatmul.mubr.msk.f32.vlgmr.msra.gmra.mxu0 %vm33_vm0, %v1770_v9  ;;  %1772 = vmatmul.mubr.msk.f32.vlgmr.msra.gmra.mxu1 %vm33_vm0, %v1770_v9 }
  0x31   :  { %1319 = vmatprep.subr.mxu0 %v1283_v10  ;;  %1390 = vmatprep.subr.mxu1 %v1285_v11 }
  0x32   :  { %1320 = vmatpush1.msra.mxu0 %v1282_v12  ;;  %1391 = vmatpush1.msra.mxu1 %v1284_v13 }
  0x33   :  { %1321 = vmatprep.subr.mxu0 %v1279_v14  ;;  %1392 = vmatprep.subr.mxu1 %v1281_v15 }
  0x34   :  { %1322 = vmatpush1.msra.mxu0 %v1278_v16  ;;  %1355 = vmatprep.mubr.f32.mxu0 %v1796_v3 }
  0x35   :  { %1393 = vmatpush1.msra.mxu1 %v1280_v17  ;;  %1426 = vmatprep.mubr.f32.mxu1 %v1796_v3 }
  0x36   :  { %1774 = vmatmul.mubr.msk.f32.vlgmr.msra.gmra.mxu0 %vm33_vm0, %v1773_v18  ;;  %1775 = vmatmul.mubr.msk.f32.vlgmr.msra.gmra.mxu1 %vm33_vm0, %v1773_v18 }
  0x37   :  { %1779 = vset.pattern.permute.xlu0 %v1797_v20 }
  0x38   :  { %1440 = vperm.xlu0 %1779, %v1437_v19  }
  0xc6   :  { %v103_v21 = vpop.f32.mrf.mxu0  ;;  %v174_v22 = vpop.f32.mrf.mxu1 }
  0xc8   :  { %v105_v23 = vpop.f32.mrf.mxu0  ;;  %v176_v24 = vpop.f32.mrf.mxu1 }
  0xcc   :  { %v248_v25 = vpop.f32.mrf.mxu0  ;;  %v319_v26 = vpop.f32.mrf.mxu1 }
  0xcd   :  { %v249_v52 = vadd.f32 %v248_v25, %v103_v21  ;;  %v320_v53 = vadd.f32 %v319_v26, %v174_v22 }
  0xce   :  { %v250_v27 = vpop.f32.mrf.mxu0  ;;  %v321_v3 = vpop.f32.mrf.mxu1 }
  0xcf   :  { %v251_v56 = vadd.f32 %v250_v27, %v105_v23  ;;  %v322_v57 = vadd.f32 %v321_v3, %v176_v24  ;;  %v1441_v24 = vpop.permute.xlu0 %1440 }
  0xd2   :  { %v403_v28 = vpop.f32.mrf.mxu0  ;;  %v474_v29 = vpop.f32.mrf.mxu1 }
  0xd3   :  { %v479_v58 = vadd.f32 %v403_v28, %v249_v52  ;;  %v481_v59 = vadd.f32 %v474_v29, %v320_v53 }
  0xd4   :  { %v405_v30 = vpop.f32.mrf.mxu0  ;;  %v476_v31 = vpop.f32.mrf.mxu1 }
  0xd5   :  { %v480_v62 = vadd.f32 %v405_v30, %v251_v56  ;;  %v482_v63 = vadd.f32 %v476_v31, %v322_v57 }
  0xd8   :  { %v562_v32 = vpop.f32.mrf.mxu0  ;;  %v633_v33 = vpop.f32.mrf.mxu1 }
  0xd9   :  { %v638_v0 = vadd.f32 %v562_v32, %v479_v58  ;;  %v640_v1 = vadd.f32 %v633_v33, %v481_v59 }
  0xda   :  { %v564_v34 = vpop.f32.mrf.mxu0  ;;  %v635_v35 = vpop.f32.mrf.mxu1 }
  0xdb   :  { %v639_v2 = vadd.f32 %v564_v34, %v480_v62  ;;  %v641_v4 = vadd.f32 %v635_v35, %v482_v63 }
  0xde   :  { %v721_v36 = vpop.f32.mrf.mxu0  ;;  %v792_v45 = vpop.f32.mrf.mxu1 }
  0xdf   :  { %v797_v5 = vadd.f32 %v721_v36, %v638_v0  ;;  %v799_v6 = vadd.f32 %v792_v45, %v640_v1 }
  0xe0   :  { %v723_v46 = vpop.f32.mrf.mxu0  ;;  %v794_v47 = vpop.f32.mrf.mxu1 }
  0xe1   :  { %v798_v9 = vadd.f32 %v723_v46, %v639_v2  ;;  %v800_v10 = vadd.f32 %v794_v47, %v641_v4 }
  0xe4   :  { %v880_v48 = vpop.f32.mrf.mxu0  ;;  %v951_v49 = vpop.f32.mrf.mxu1 }
  0xe5   :  { %v956_v11 = vadd.f32 %v880_v48, %v797_v5  ;;  %v958_v12 = vadd.f32 %v951_v49, %v799_v6 }
  0xe6   :  { %v882_v50 = vpop.f32.mrf.mxu0  ;;  %v953_v51 = vpop.f32.mrf.mxu1 }
  0xe7   :  { %v957_v15 = vadd.f32 %v882_v50, %v798_v9  ;;  %v959_v16 = vadd.f32 %v953_v51, %v800_v10 }
  0xea   :  { %v1039_v54 = vpop.f32.mrf.mxu0  ;;  %v1110_v55 = vpop.f32.mrf.mxu1 }
  0xeb   :  { %v1115_v17 = vadd.f32 %v1039_v54, %v956_v11  ;;  %v1117_v18 = vadd.f32 %v1110_v55, %v958_v12 }
  0xec   :  { %v1041_v60 = vpop.f32.mrf.mxu0  ;;  %v1112_v61 = vpop.f32.mrf.mxu1 }
  0xed   :  { %v1116_v19 = vadd.f32 %v1041_v60, %v957_v15  ;;  %v1118_v21 = vadd.f32 %v1112_v61, %v959_v16 }
  0xf0   :  { %v1198_v7 = vpop.f32.mrf.mxu0  ;;  %v1269_v8 = vpop.f32.mrf.mxu1 }
  0xf1   :  { %v1274_v22 = vadd.f32 %v1198_v7, %v1115_v17  ;;  %v1276_v23 = vadd.f32 %v1269_v8, %v1117_v18 }
  0xf2   :  { %v1200_v13 = vpop.f32.mrf.mxu0  ;;  %v1271_v14 = vpop.f32.mrf.mxu1 }
  0xf3   :  { %v1275_v27 = vadd.f32 %v1200_v13, %v1116_v19  ;;  %v1277_v3 = vadd.f32 %v1271_v14, %v1118_v21 }
  0xf6   :  { %v1357_v25 = vpop.f32.mrf.mxu0  ;;  %v1428_v26 = vpop.f32.mrf.mxu1 }
  0xf7   :  { %v1433_v28 = vadd.f32 %v1357_v25, %v1274_v22  ;;  %v1435_v29 = vadd.f32 %v1428_v26, %v1276_v23 }
  0xf8   :  { %v1359_v30 = vpop.f32.mrf.mxu0  ;;  %v1430_v31 = vpop.f32.mrf.mxu1 }
  0xf9   :  { %v1443_v32 = vadd.f32 %v1441_v24, %v1433_v28  ;;  %v1445_v33 = vadd.f32 %v1441_v24, %v1435_v29  ;;  %v1434_v34 = vadd.f32 %v1359_v30, %v1275_v27  ;;  %v1436_v35 = vadd.f32 %v1430_v31, %v1277_v3 }
  0xfb   :  { %v1448_v36 = vsel %vm1447_vm1, %v1443_v32, -inf  ;;  %v1462_v45 = vsel %vm1447_vm1, %v1445_v33, -inf  ;;  %v1444_v46 = vadd.f32 %v1441_v24, %v1434_v34  ;;  %v1446_v47 = vadd.f32 %v1441_v24, %v1436_v35 }
  0xfc   :  { %v1449_v48 = vrot.slane %v1448_v36, 4  ;;  %v1463_v49 = vrot.slane %v1462_v45, 4 }
  0xfd   :  { %v1455_v50 = vsel %vm1447_vm1, %v1444_v46, -inf  ;;  %v1469_v51 = vsel %vm1447_vm1, %v1446_v47, -inf }
  0xfe   :  { %v1450_v52 = vmax.f32 %v1448_v36, %v1449_v48  ;;  %v1464_v53 = vmax.f32 %v1462_v45, %v1463_v49  ;;  %v1456_v54 = vrot.slane %v1455_v50, 4  ;;  %v1470_v55 = vrot.slane %v1469_v51, 4 }
 0x100   :  { %v1451_v56 = vrot.slane %v1450_v52, 2  ;;  %v1465_v57 = vrot.slane %v1464_v53, 2  ;;  %v1457_v58 = vmax.f32 %v1455_v50, %v1456_v54  ;;  %v1471_v59 = vmax.f32 %v1469_v51, %v1470_v55 }
 0x102   :  { %v1452_v60 = vmax.f32 %v1450_v52, %v1451_v56  ;;  %v1466_v61 = vmax.f32 %v1464_v53, %v1465_v57  ;;  %v1458_v62 = vrot.slane %v1457_v58, 2  ;;  %v1472_v63 = vrot.slane %v1471_v59, 2 }
 0x104   :  { %v1453_v0 = vrot.slane %v1452_v60, 1  ;;  %v1467_v1 = vrot.slane %v1466_v61, 1  ;;  %v1459_v2 = vmax.f32 %v1457_v58, %v1458_v62  ;;  %v1473_v4 = vmax.f32 %v1471_v59, %v1472_v63 }
 0x105   :  { %v1524_v59 = vlaneseq }
 0x106   :  { %v1454_v5 = vmax.f32 %v1452_v60, %v1453_v0  ;;  %v1468_v6 = vmax.f32 %v1466_v61, %v1467_v1  ;;  %v1460_v7 = vrot.slane %v1459_v2, 1  ;;  %v1474_v8 = vrot.slane %v1473_v4, 1 }
 0x107   :  { %v2135_v60 = vshrl.u32 %v1524_v59, 7  ;;  %vm1743_vm14 = vcmp.lt.s32.totalorder %v1524_v59, 512 }
 0x108   :  { %v1476_v9 = vsub.f32 %v1443_v32, %v1454_v5  ;;  %v1478_v10 = vsub.f32 %v1445_v33, %v1468_v6  ;;  %v1461_v11 = vmax.f32 %v1459_v2, %v1460_v7  ;;  %v1475_v12 = vmax.f32 %v1473_v4, %v1474_v8 }
 0x109   :  { %v1526_v61 = vsub.s32 0, %v2135_v60  ;;  %v1546_v62 = vsub.s32 1, %v2135_v60  ;;  %v1582_v63 = vsub.s32 2, %v2135_v60  ;;  %v1606_v0 = vsub.s32 3, %v2135_v60 }
 0x10a   :  { %v1480_v13 = vmul.f32 1.442695, %v1476_v9  ;;  %v1484_v14 = vmul.f32 1.442695, %v1478_v10  ;;  %v1477_v15 = vsub.f32 %v1444_v46, %v1461_v11  ;;  %v1479_v16 = vsub.f32 %v1446_v47, %v1475_v12 }
 0x10c   :  { %1780 = vpow2.f32 %v1480_v13  ;;  %v1482_v17 = vmul.f32 1.442695, %v1477_v15  ;;  %v1486_v18 = vmul.f32 1.442695, %v1479_v16 }
 0x10d   :  { %1782 = vpow2.f32 %v1484_v14 }
 0x10e   :  { %1784 = vpow2.f32 %v1482_v17 }
 0x10f   :  { %1786 = vpow2.f32 %v1486_v18 }
 0x119   :  { %v1781_v19 = vpop.eup %1780 }
 0x11a   :  { %v1783_v21 = vpop.eup %1782  ;;  %v1488_v22 = vsel %vm1447_vm1, %v1781_v19, 0.0 }
 0x11b   :  { %v1785_v23 = vpop.eup %1784  ;;  %v1489_v24 = vrot.slane %v1488_v22, 4  ;;  %v1502_v25 = vsel %vm1447_vm1, %v1783_v21, 0.0 }
 0x11c   :  { %v1787_v26 = vpop.eup %1786  ;;  %v1503_v27 = vrot.slane %v1502_v25, 4  ;;  %v1495_v3 = vsel %vm1447_vm1, %v1785_v23, 0.0 }
 0x11d   :  { %v1490_v28 = vadd.f32 %v1489_v24, %v1488_v22  ;;  %v1496_v29 = vrot.slane %v1495_v3, 4  ;;  %v1509_v30 = vsel %vm1447_vm1, %v1787_v26, 0.0 }
 0x11e   :  { %v1504_v31 = vadd.f32 %v1503_v27, %v1502_v25  ;;  %v1510_v32 = vrot.slane %v1509_v30, 4 }
 0x11f   :  { %v1491_v33 = vrot.slane %v1490_v28, 2  ;;  %v1497_v34 = vadd.f32 %v1496_v29, %v1495_v3 }
 0x120   :  { %v1505_v35 = vrot.slane %v1504_v31, 2  ;;  %v1511_v36 = vadd.f32 %v1510_v32, %v1509_v30 }
 0x121   :  { %v1492_v45 = vadd.f32 %v1491_v33, %v1490_v28  ;;  %v1498_v46 = vrot.slane %v1497_v34, 2 }
 0x122   :  { %v1506_v47 = vadd.f32 %v1505_v35, %v1504_v31  ;;  %v1512_v48 = vrot.slane %v1511_v36, 2 }
 0x123   :  { %v1493_v49 = vrot.slane %v1492_v45, 1  ;;  %v1499_v50 = vadd.f32 %v1498_v46, %v1497_v34 }
 0x124   :  { %v1507_v51 = vrot.slane %v1506_v47, 1  ;;  %v1513_v52 = vadd.f32 %v1512_v48, %v1511_v36 }
 0x125   :  { %v1494_v53 = vadd.f32 %v1493_v49, %v1492_v45  ;;  %v1500_v54 = vrot.slane %v1499_v50, 1 }
 0x126   :  { %v1508_v55 = vadd.f32 %v1507_v51, %v1506_v47  ;;  %v1514_v56 = vrot.slane %v1513_v52, 1 }
 0x127   :  { %1788 = vrcp.f32 %v1494_v53  ;;  %v1501_v57 = vadd.f32 %v1500_v54, %v1499_v50 }
 0x128   :  { %1790 = vrcp.f32 %v1508_v55  ;;  %v1515_v58 = vadd.f32 %v1514_v56, %v1513_v52 }
 0x129   :  { %1792 = vrcp.f32 %v1501_v57 }
 0x12a   :  { %1794 = vrcp.f32 %v1515_v58 }
 0x134   :  { %v1789_v1 = vpop.eup %1788 }
 0x135   :  { %v1791_v2 = vpop.eup %1790  ;;  %v1520_v4 = vmul.f32 %v1789_v1, %v1781_v19 }
 0x136   :  { %v1522_v5 = vmul.f32 %v1791_v2, %v1783_v21  ;;  %v1793_v6 = vpop.eup %1792 }
 0x137   :  { %v1527_v7 = vrot.slane %v1520_v4, %v1526_v61  ;;  %v1547_v8 = vrot.slane %v1520_v4, %v1546_v62  ;;  %v1583_v9 = vrot.slane %v1520_v4, %v1582_v63  ;;  %v1607_v10 = vrot.slane %v1520_v4, %v1606_v0  ;;  %v1795_v11 = vpop.eup %1794 }
 0x138   :  { %v1535_v12 = vrot.slane %v1522_v5, %v1526_v61  ;;  %v1555_v13 = vrot.slane %v1522_v5, %v1546_v62  ;;  %v1591_v14 = vrot.slane %v1522_v5, %v1582_v63  ;;  %v1615_v15 = vrot.slane %v1522_v5, %v1606_v0 }
 0x139   :  { %v1560_v16 = vmul.f32 %v1547_v8, %v1978_v43  ;;  %v1620_v17 = vmul.f32 %v1607_v10, %v1954_v39  ;;  %v1540_v18 = vmul.f32 %v1527_v7, %v1978_v43  ;;  %v1521_v24 = vmul.f32 %v1793_v6, %v1785_v23 }
 0x13a   :  { %v1562_v22 = vmul.f32 %v1555_v13, %v1985_v44  ;;  %v1622_v21 = vmul.f32 %v1615_v15, %v1959_v40  ;;  %v1523_v25 = vmul.f32 %v1795_v11, %v1787_v26  ;;  %v1542_v27 = vmul.f32 %v1535_v12, %v1985_v44 }
 0x13b   :  { %v1568_v19 = vrot.slane %v1560_v16, 4  ;;  %v1596_v28 = vmul.f32 %v1583_v9, %v1954_v39  ;;  %v1598_v29 = vmul.f32 %v1591_v14, %v1959_v40  ;;  %v1628_v31 = vrot.slane %v1620_v17, 4 }
 0x13c   :  { %v1570_v3 = vrot.slane %v1562_v22, 4  ;;  %v1531_v32 = vrot.slane %v1521_v24, %v1526_v61  ;;  %v1551_v33 = vrot.slane %v1521_v24, %v1546_v62  ;;  %v1611_v43 = vrot.slane %v1521_v24, %v1606_v0 }
 0x13d   :  { %v1576_v30 = vadd.f32 %v1568_v19, %v1540_v18  ;;  %v1539_v35 = vrot.slane %v1523_v25, %v1526_v61  ;;  %v1559_v36 = vrot.slane %v1523_v25, %v1546_v62  ;;  %v1630_v46 = vrot.slane %v1622_v21, 4 }
 0x13e   :  { %v1578_v34 = vadd.f32 %v1570_v3, %v1542_v27  ;;  %v1561_v23 = vmul.f32 %v1551_v33, %v1966_v41  ;;  %v1587_v26 = vrot.slane %v1521_v24, %v1582_v63  ;;  %v1541_v44 = vmul.f32 %v1531_v32, %v1966_v41 }
 0x13f   :  { %v1600_v45 = vadd.f32 %v1596_v28, %v1576_v30  ;;  %v1621_v39 = vmul.f32 %v1611_v43, %v1943_v37  ;;  %v1563_v40 = vmul.f32 %v1559_v36, %v1971_v42  ;;  %v1595_v50 = vrot.slane %v1523_v25, %v1582_v63 }
 0x140   :  { %v1602_v47 = vadd.f32 %v1598_v29, %v1578_v34  ;;  %v1569_v49 = vrot.slane %v1561_v23, 4  ;;  %v1619_v51 = vrot.slane %v1523_v25, %v1606_v0  ;;  %v1543_v53 = vmul.f32 %v1539_v35, %v1971_v42 }
 0x141   :  { %v1636_v48 = vadd.f32 %v1628_v31, %v1600_v45  ;;  %v1571_v54 = vrot.slane %v1563_v40, 4  ;;  %v1597_v57 = vmul.f32 %v1587_v26, %v1943_v37  ;;  %v1599_v62 = vmul.f32 %v1595_v50, %v1948_v38 }
 0x142   :  { %v1638_v52 = vadd.f32 %v1630_v46, %v1602_v47  ;;  %v1577_v56 = vadd.f32 %v1569_v49, %v1541_v44  ;;  %v1623_v58 = vmul.f32 %v1619_v51, %v1948_v38  ;;  %v1629_v2 = vrot.slane %v1621_v39, 4 }
 0x143   :  { %v1644_v55 = vrot.slane %v1636_v48, 7  ;;  %v1579_v41 = vadd.f32 %v1571_v54, %v1543_v53  ;;  %v1798_v13 = vmov 1966171168  }
 0x144   :  { %v1646_v61 = vrot.slane %v1638_v52, 7  ;;  %v1601_v1 = vadd.f32 %v1597_v57, %v1577_v56  ;;  %v1631_v4 = vrot.slane %v1623_v58, 4  ;;  %v1719_v14 = vunpack.c.l.s4 %v1798_v13 }
 0x145   :  { %vm1652_vm2 = vcmp.gt.f32.partialorder %v1636_v48, %v1644_v55  ;;  %v1603_v42 = vadd.f32 %v1599_v62, %v1579_v41 }
 0x146   :  { %vm1654_vm3 = vcmp.gt.f32.partialorder %v1638_v52, %v1646_v61  ;;  %v1656_v63 = vsel %vm1652_vm2, %v1636_v48, %v1644_v55  ;;  %v1660_v0 = vsel %vm1652_vm2, 1, %v1797_v20  ;;  %v1637_v9 = vadd.f32 %v1629_v2, %v1601_v1 }
 0x147   :  { %v1658_v5 = vsel %vm1654_vm3, %v1638_v52, %v1646_v61  ;;  %v1662_v6 = vsel %vm1654_vm3, 1, %v1797_v20  ;;  %v1668_v7 = vrot.slane %v1656_v63, 7  ;;  %v1684_v8 = vrot.slane %v1660_v0, 7 }
 0x148   :  { %v1670_v37 = vrot.slane %v1658_v5, 7  ;;  %v1639_v10 = vadd.f32 %v1631_v4, %v1603_v42  ;;  %v1645_v38 = vrot.slane %v1637_v9, 7  ;;  %v1686_v12 = vrot.slane %v1662_v6, 7 }
 0x149   :  { %vm1676_vm4 = vcmp.gt.f32.partialorder %v1636_v48, %v1668_v7  ;;  %v1720_v3 = vunpack.c.0.s8 %v1719_v14 }
 0x14a   :  { %vm1678_vm5 = vcmp.gt.f32.partialorder %v1638_v52, %v1670_v37  ;;  %v1680_v11 = vsel %vm1676_vm4, %v1636_v48, %v1668_v7  ;;  %v1688_v15 = vsel %vm1676_vm4, 2, %v1684_v8  ;;  %vm1653_vm6 = vcmp.gt.f32.partialorder %v1637_v9, %v1645_v38 }
 0x14b   :  { %v1647_v16 = vrot.slane %v1639_v10, 7  ;;  %v1682_v17 = vsel %vm1678_vm5, %v1638_v52, %v1670_v37  ;;  %v1657_v18 = vsel %vm1653_vm6, %v1637_v9, %v1645_v38  ;;  %v1661_v22 = vsel %vm1653_vm6, 1, %v1797_v20 }
 0x14c   :  { %v1696_v19 = vrot.slane %v1680_v11, 7  ;;  %v1669_v21 = vrot.slane %v1657_v18, 7  ;;  %v1685_v24 = vrot.slane %v1661_v22, 7  ;;  %v1690_v25 = vsel %vm1678_vm5, 2, %v1686_v12 }
 0x14d   :  { %v1708_v27 = vrot.slane %v1688_v15, 7  ;;  %vm1655_vm7 = vcmp.gt.f32.partialorder %v1639_v10, %v1647_v16  ;;  %v1698_v28 = vrot.slane %v1682_v17, 7  ;;  %v1710_v36 = vrot.slane %v1690_v25, 7 }
 0x14e   :  { %vm1677_vm8 = vcmp.gt.f32.partialorder %v1637_v9, %v1669_v21  ;;  %v1659_v29 = vsel %vm1655_vm7, %v1639_v10, %v1647_v16  ;;  %v1663_v30 = vsel %vm1655_vm7, 1, %v1797_v20  ;;  %vm1704_vm9 = vcmp.gt.f32.partialorder %v1636_v48, %v1696_v19 }
 0x14f   :  { %v1681_v31 = vsel %vm1677_vm8, %v1637_v9, %v1669_v21  ;;  %v1689_v32 = vsel %vm1677_vm8, 2, %v1685_v24  ;;  %v1671_v33 = vrot.slane %v1659_v29, 7  ;;  %v1687_v34 = vrot.slane %v1663_v30, 7 }
 0x150   :  { %v1697_v43 = vrot.slane %v1681_v31, 7  ;;  %v1709_v35 = vrot.slane %v1689_v32, 7  ;;  %v1723_v45 = vsub.s32 %v1720_v3, %v2135_v60  ;;  %vm1706_vm11 = vcmp.gt.f32.partialorder %v1638_v52, %v1698_v28 }
 0x151   :  { %vm1679_vm10 = vcmp.gt.f32.partialorder %v1639_v10, %v1671_v33  ;;  %v1712_v26 = vsel %vm1704_vm9, 3, %v1708_v27  ;;  %v1714_v40 = vsel %vm1706_vm11, 3, %v1710_v36 }
 0x152   :  { %vm1705_vm12 = vcmp.gt.f32.partialorder %v1637_v9, %v1697_v43  ;;  %v1683_v46 = vsel %vm1679_vm10, %v1639_v10, %v1671_v33  ;;  %v1691_v23 = vsel %vm1679_vm10, 2, %v1687_v34 }
 0x153   :  { %v1713_v47 = vsel %vm1705_vm12, 3, %v1709_v35  ;;  %v1699_v44 = vrot.slane %v1683_v46, 7  ;;  %v1711_v39 = vrot.slane %v1691_v23, 7 }
 0x154   :  { %v1716_v20 = vcombine.low %v1712_v26, %v1713_v47 }
 0x155   :  { %vm1707_vm13 = vcmp.gt.f32.partialorder %v1639_v10, %v1699_v44 }
 0x156   :  { %v1715_v49 = vsel %vm1707_vm13, 3, %v1711_v39  ;;  %v1724_v50 = vrot.slane %v1716_v20, %v1723_v45 }
 0x157   :  { %v1717_v48 = vcombine.low %v1714_v40, %v1715_v49 }
 0x159   :  { %v1731_v51 = vrot.slane %v1717_v48, %v1723_v45 }
 0x15b   :  { %v1732_v53 = vcombine.high %v1724_v50, %v1731_v51 }
 0x15d   :  { %v1739_v54 = vrot.slane %v1732_v53, %v1723_v45 }
 0x15f   :  { %v1740_v60 = vcombine.high %v1739_v54, %v1739_v54 }
 0x161   :  { %1745 = vst.msk [vmem:[%s2169_s3] sm:$0xf] %vm1743_vm14, %v1740_v60 }

</bundles_post_ra>
